<compile_context>
chip_gen: v6e
topology: v6e:2x2x1
jax: 0.10.0
libtpu: 0.0.40
codegen_flags: <defaults>
</compile_context>

<pallas_src>
from functools import partial

import jax
import jax.numpy as jnp
from jax.experimental import pallas as pl
from jax.experimental.pallas import tpu as pltpu


def _round_up(a, b):
    return -(-a // b) * b


def _pow_by_squaring(base, exponent):
    """base ** exponent for a static positive int exponent (VPU multiplies only)."""
    result = None
    b = base
    e = int(exponent)
    while e > 0:
        if e & 1:
            result = b if result is None else result * b
        e >>= 1
        if e:
            b = b * b
    return result


def gem_kernel(p_ref, x_ref, o_ref, acc_ref, *, eps, p_static, k_total, mask_k,
               use_bf16_transcendentals):
    # p_ref:   (1,) f32 in SMEM (learnable GeM exponent; unused if p_static)
    # x_ref:   (bm, bk) input tile in VMEM (incoming dtype)
    # o_ref:   (bm, 1) output tile (written once, on the last K tile)
    # acc_ref: (bm, acc_w) f32 partial sums, persistent across the K grid axis
    k_idx = pl.program_id(1)
    last_k = pl.num_programs(1) - 1
    bm, bk = x_ref.shape
    chunked = (bk % 128 == 0)

    @pl.when(k_idx == 0)
    def _init():
        acc_ref[...] = jnp.zeros_like(acc_ref)

    xc = jnp.maximum(x_ref[...].astype(jnp.float32), eps)     # clamp(min=eps)

    if p_static is not None:
        # Integer-exponent fast path: pure VPU multiplies, no EUP in hot loop.
        xp = _pow_by_squaring(xc, p_static)
    elif use_bf16_transcendentals:
        # Opt-in (~1e-2 rel. error): bf16 log/exp doubles EUP throughput on
        # v6e/v7x.  Do NOT enable on v5e (no bf16 EUP).
        pb = p_ref[0].astype(jnp.bfloat16)
        xp = jnp.exp(pb * jnp.log(xc.astype(jnp.bfloat16))).astype(jnp.float32)
    else:
        xp = jnp.exp(p_ref[0] * jnp.log(xc))                   # x**p (x > 0)

    def lane_partial(v):
        # (bm, bk) -> (bm, acc_w) partial sums.  When bk is a multiple of 128
        # this uses only 128-lane-aligned VALU adds (no per-tile XLU reduce).
        if not chunked:
            return jnp.sum(v, axis=-1, keepdims=True)
        part = v[:, 0:128]
        for c in range(1, bk // 128):
            part = part + v[:, c * 128:(c + 1) * 128]
        return part

    if mask_k:
        # Keep the boundary mask off the steady-state path.
        @pl.when(k_idx != last_k)
        def _accumulate():
            acc_ref[...] += lane_partial(xp)

        @pl.when(k_idx == last_k)
        def _accumulate_masked():
            col = jax.lax.broadcasted_iota(jnp.int32, xp.shape, 1) + k_idx * bk
            acc_ref[...] += lane_partial(jnp.where(col < k_total, xp, 0.0))
    else:
        acc_ref[...] += lane_partial(xp)

    @pl.when(k_idx == last_k)
    def _finalize():
        row_sum = jnp.sum(acc_ref[...], axis=-1, keepdims=True)   # (bm, 1)
        mean = row_sum * (1.0 / k_total)
        if p_static is not None:
            inv_p = 1.0 / float(p_static)
        else:
            inv_p = 1.0 / p_ref[0]
        # mean >= eps**p > 0 thanks to the clamp, so exp/log == pow.
        o_ref[...] = jnp.exp(jnp.log(mean) * inv_p).astype(o_ref.dtype)


def gem_pallas(x, p, eps=1e-6, *, p_static=None, use_bf16_transcendentals=False,
               max_block_k=4096, vmem_budget_bytes=30 * 1024 * 1024):
    """Generalized-mean pooling.  x: (N, C, H, W); p: shape (1,).  -> (N, C, 1, 1)."""
    N, C, H, W = x.shape
    M, K = N * C, H * W
    itemsize = jnp.dtype(x.dtype).itemsize

    # ---- K (reduction / lane) tiling --------------------------------------
    max_bk = _round_up(max_block_k, 128)
    if K <= max_bk:
        bk, num_k, mask_k = K, 1, False            # single full-extent K tile
    else:
        # Balanced 128-multiples so only the genuine last tile is partial.
        bk = _round_up(pl.cdiv(K, pl.cdiv(K, max_bk)), 128)
        num_k = pl.cdiv(K, bk)
        mask_k = (K % bk) != 0

    # ---- M (row / sublane) tiling from a VMEM byte budget -----------------
    # Per-row footprint: double-buffered input tile + ~3 live f32 temporaries
    # of the elementwise chain + (bm,128) f32 accumulator + padded output bufs.
    per_row = 2 * bk * itemsize + 3 * bk * 4 + 128 * 4 + 2 * 128 * itemsize
    bm_cap = max(8, (vmem_budget_bytes // per_row) // 8 * 8)
    if M >= 16:
        # Keep >= 2 row blocks so the "parallel" M axis can shard across both
        # v7x TensorCores (no effect on 1-TC v5e/v6e).
        bm_cap = min(bm_cap, _round_up(pl.cdiv(M, 2), 8))
    if bm_cap >= M:
        bm, num_m = M, 1                           # single full-extent row block
    else:
        bm, num_m = bm_cap, pl.cdiv(M, bm_cap)
    m_pad = num_m * bm

    acc_w = 128 if (bk % 128 == 0) else 1

    x2 = x.reshape(M, K)                           # dtype preserved (bf16 stays bf16)
    p1 = jnp.asarray(p, dtype=jnp.float32).reshape((1,))

    if p_static is not None:
        assert int(p_static) >= 1
        n_mul = max(int(p_static).bit_length() + bin(int(p_static)).count("1") - 2, 0)
        flops = (2 + n_mul) * M * K
        transcendentals = 2 * M
    else:
        flops = 3 * M * K
        transcendentals = 2 * M * K + 2 * M

    kernel = partial(
        gem_kernel, eps=float(eps), p_static=p_static, k_total=K, mask_k=mask_k,
        use_bf16_transcendentals=use_bf16_transcendentals)

    out = pl.pallas_call(
        kernel,
        out_shape=jax.ShapeDtypeStruct((m_pad, 1), x.dtype),
        grid=(num_m, num_k),
        in_specs=[
            pl.BlockSpec(memory_space=pltpu.SMEM),             # p (scalar)
            pl.BlockSpec((bm, bk), lambda i, k: (i, k)),       # x tile
        ],
        out_specs=pl.BlockSpec((bm, 1), lambda i, k: (i, 0)),  # resident over k
        scratch_shapes=[pltpu.VMEM((bm, acc_w), jnp.float32)],
        compiler_params=pltpu.CompilerParams(
            dimension_semantics=("parallel", "arbitrary"),
            vmem_limit_bytes=48 * 1024 * 1024,
        ),
        cost_estimate=pl.CostEstimate(
            flops=int(flops),
            transcendentals=int(transcendentals),
            bytes_accessed=int(M * K * itemsize + M * itemsize + 4)),
    )(p1, x2)

    # Drop padded rows, restore the (N, C, 1, 1) NCHW output.
    return out[:M, 0].reshape(N, C, 1, 1)


if __name__ == "__main__":
    key = jax.random.PRNGKey(0)
    eps = 1e-6
    # GeM.__init__ default: p = Parameter(torch.ones(1) * 3)
    p = jnp.ones((1,), dtype=jnp.float32) * 3.0

    def reference(x, p, eps):
        xc = jnp.maximum(x.astype(jnp.float32), eps) ** p[0]
        return jnp.mean(xc, axis=(-2, -1), keepdims=True) ** (1.0 / p[0])

    k1, k2, k3 = jax.random.split(key, 3)

    # Case 1: the module's nominal small shape (single full-extent tile).
    x1 = jax.random.normal(k1, (2, 4, 16, 16), dtype=jnp.float32)
    out1 = jax.block_until_ready(gem_pallas(x1, p, eps=eps))
    ref1 = reference(x1, p, eps)
    assert out1.shape == (2, 4, 1, 1)
    assert jnp.allclose(out1, ref1, rtol=5e-5, atol=1e-5), "case 1 (generic p) failed"

    # Case 2: ragged dims (M=3 rows, K=100 lanes) -> non-(8,128)-aligned
    # full-extent tiles, direct-reduce accumulator path.
    x2 = jax.random.normal(k2, (1, 3, 10, 10), dtype=jnp.float32)
    out2 = jax.block_until_ready(gem_pallas(x2, p, eps=eps))
    ref2 = reference(x2, p, eps)
    assert out2.shape == (1, 3, 1, 1)
    assert jnp.allclose(out2, ref2, rtol=5e-5, atol=1e-5), "case 2 (ragged) failed"

    # Case 3: K > max_block_k -> multi-K-tile streaming accumulation with a
    # masked last tile, chunked (bm,128) accumulator, and a 2-block M split.
    x3 = jax.random.normal(k3, (1, 16, 65, 65), dtype=jnp.float32)
    out3 = jax.block_until_ready(gem_pallas(x3, p, eps=eps))
    ref3 = reference(x3, p, eps)
    assert out3.shape == (1, 16, 1, 1)
    assert jnp.allclose(out3, ref3, rtol=5e-5, atol=1e-5), "case 3 (multi-tile) failed"

    # Case 4: static integer-p fast path (no per-element transcendentals).
    out4 = jax.block_until_ready(gem_pallas(x1, p, eps=eps, p_static=3))
    assert jnp.allclose(out4, ref1, rtol=5e-5, atol=1e-5), "case 4 (p_static) failed"

    print("KERNEL_OK")
</pallas_src>

<mosaic_0001>
module attributes {stable_mosaic.version = 11 : i64} {
  func.func @gem_kernel(%arg0: i32, %arg1: i32, %arg2: memref<1xf32, #tpu.memory_space<smem>>, %arg3: memref<8x256xf32, #tpu.memory_space<vmem>>, %arg4: memref<8x1xf32, #tpu.memory_space<vmem>>, %arg5: memref<8x128xf32, #tpu.memory_space<vmem>>) attributes {dimension_semantics = [#tpu.dimension_semantics<parallel>, #tpu.dimension_semantics<arbitrary>], iteration_bounds = array<i64: 1, 1>, scalar_prefetch = 0 : i64, scratch_operands = 1 : i64, tpu.core_type = #tpu.core_type<tc>, window_params = [{transform_indices = @transform_0, window_bounds = array<i64: 1>}, {transform_indices = @transform_1, window_bounds = array<i64: 8, 256>}, {transform_indices = @transform_2, window_bounds = array<i64: 8, 1>}]} {
    %c0_i32 = arith.constant 0 : i32
    %0 = arith.cmpi eq, %arg1, %c0_i32 : i32
    %1 = arith.extui %0 : i1 to i32
    %c0_i32_0 = arith.constant 0 : i32
    %2 = arith.cmpi ne, %1, %c0_i32_0 : i32
    scf.if %2 {
      %cst_9 = arith.constant 0.000000e+00 : f32
      %20 = vector.broadcast %cst_9 : f32 to vector<8x128xf32>
      %c0_10 = arith.constant 0 : index
      %c0_11 = arith.constant 0 : index
      %21 = vector.load %arg5[%c0_10, %c0_11] : memref<8x128xf32, #tpu.memory_space<vmem>>, vector<8x128xf32>
      tpu.vector_store %arg5[%c0_10, %c0_11], %20 {strides = array<i32>} : memref<8x128xf32, #tpu.memory_space<vmem>>, vector<8x128xf32>,
    } else {
    }
    %c0 = arith.constant 0 : index
    %c0_1 = arith.constant 0 : index
    %3 = vector.load %arg3[%c0, %c0_1] : memref<8x256xf32, #tpu.memory_space<vmem>>, vector<8x256xf32>
    %cst = arith.constant 9.99999997E-7 : f32
    %4 = vector.broadcast %cst : f32 to vector<8x256xf32>
    %5 = arith.maximumf %3, %4 : vector<8x256xf32>
    %c0_2 = arith.constant 0 : index
    %6 = memref.load %arg2[%c0_2] : memref<1xf32, #tpu.memory_space<smem>>
    %7 = math.log %5 : vector<8x256xf32>
    %8 = vector.broadcast %6 : f32 to vector<8x256xf32>
    %9 = arith.mulf %8, %7 : vector<8x256xf32>
    %10 = math.exp %9 : vector<8x256xf32>
    %c0_3 = arith.constant 0 : index
    %c0_4 = arith.constant 0 : index
    %11 = vector.load %arg5[%c0_3, %c0_4] : memref<8x128xf32, #tpu.memory_space<vmem>>, vector<8x128xf32>
    %12 = vector.extract_strided_slice %10 {offsets = [0, 0], sizes = [8, 128], strides = [1, 1]} : vector<8x256xf32> to vector<8x128xf32>
    %13 = vector.extract_strided_slice %10 {offsets = [0, 128], sizes = [8, 128], strides = [1, 1]} : vector<8x256xf32> to vector<8x128xf32>
    %14 = arith.addf %12, %13 : vector<8x128xf32>
    %15 = arith.addf %11, %14 : vector<8x128xf32>
    %c0_5 = arith.constant 0 : index
    %c0_6 = arith.constant 0 : index
    %16 = vector.load %arg5[%c0_5, %c0_6] : memref<8x128xf32, #tpu.memory_space<vmem>>, vector<8x128xf32>
    tpu.vector_store %arg5[%c0_5, %c0_6], %15 {strides = array<i32>} : memref<8x128xf32, #tpu.memory_space<vmem>>, vector<8x128xf32>,
    %c0_i32_7 = arith.constant 0 : i32
    %17 = arith.cmpi eq, %arg1, %c0_i32_7 : i32
    %18 = arith.extui %17 : i1 to i32
    %c0_i32_8 = arith.constant 0 : i32
    %19 = arith.cmpi ne, %18, %c0_i32_8 : i32
    scf.if %19 {
      %c0_9 = arith.constant 0 : index
      %c0_10 = arith.constant 0 : index
      %20 = vector.load %arg5[%c0_9, %c0_10] : memref<8x128xf32, #tpu.memory_space<vmem>>, vector<8x128xf32>
      %cst_11 = arith.constant dense<0.000000e+00> : vector<8xf32>
      %21 = vector.multi_reduction <add>, %20, %cst_11 [1] : vector<8x128xf32> to vector<8xf32>
      %22 = vector.shape_cast %21 : vector<8xf32> to vector<8x1xf32>
      %cst_12 = arith.constant 3.906250e-03 : f32
      %23 = vector.broadcast %cst_12 : f32 to vector<8x1xf32>
      %24 = arith.mulf %22, %23 : vector<8x1xf32>
      %c0_13 = arith.constant 0 : index
      %25 = memref.load %arg2[%c0_13] : memref<1xf32, #tpu.memory_space<smem>>
      %cst_14 = arith.constant 1.000000e+00 : f32
      %26 = arith.divf %cst_14, %25 : f32
      %27 = math.log %24 : vector<8x1xf32>
      %28 = vector.broadcast %26 : f32 to vector<8x1xf32>
      %29 = arith.mulf %27, %28 : vector<8x1xf32>
      %30 = math.exp %29 : vector<8x1xf32>
      %c0_15 = arith.constant 0 : index
      %c0_16 = arith.constant 0 : index
      %31 = vector.load %arg4[%c0_15, %c0_16] : memref<8x1xf32, #tpu.memory_space<vmem>>, vector<8x1xf32>
      tpu.vector_store %arg4[%c0_15, %c0_16], %30 {strides = array<i32>} : memref<8x1xf32, #tpu.memory_space<vmem>>, vector<8x1xf32>,
    } else {
    }
    return
  }
  func.func @transform_0(%arg0: i32, %arg1: i32) -> i32 {
    %c0_i32 = arith.constant 0 : i32
    %c0_i32_0 = arith.constant 0 : i32
    return %c0_i32 : i32
  }
  func.func @transform_1(%arg0: i32, %arg1: i32) -> (i32, i32) {
    %c0_i32 = arith.constant 0 : i32
    return %arg0, %arg1 : i32, i32
  }
  func.func @transform_2(%arg0: i32, %arg1: i32) -> (i32, i32) {
    %c0_i32 = arith.constant 0 : i32
    %c0_i32_0 = arith.constant 0 : i32
    return %arg0, %c0_i32 : i32, i32
  }
}

</mosaic_0001>

<bundles_post_ra>
// kernel: tpu_custom_call.1
= control target key start
LH: loop header
LB: loop body
LE: loop exit
PB: predicated region body
PF: predicated region fallthrough
CT: control target
= control target key end

     0   :  { %8 = vsyncpa [#allocation5], 0  ;;  %s112_s9 = smov [#allocation4]   ;;  %s137_s0 = inlined_call_operand.<no memory space> [shape: f32[1], index: 0, kind: input, shape index: {}]   ;;  %s138_s1 = inlined_call_operand.hbm [shape: f32[8,256], index: 1, kind: input, shape index: {}]   ;;  %s139_s2 = inlined_call_operand.vmem [shape: f32[8,1], index: 2, kind: output, shape index: {}]  }
   0x1   :  { %s17_s10 = sshll.u32 %s112_s9, 4  ;;  %s18_s10 = int_to_ptr.vmem [resolvable:$true] %s17_s10 }
   0x2   :  { %s98_s11 = scalar_lea.vmem %s18_s10, 256  ;;  %p103_p1 = scmp.lt.s32.totalorder %s18_s10, %s18_s10 }
   0x3   :  { %p99_p0 = scmp.ne.s32.totalorder %s18_s10, %s98_s11  ;;  %p104_p2 = scmp.lt.s32.totalorder %s98_s11, %s98_s11 }
   0x5   :  { %p105_p3 = por %p104_p2, %p103_p1 }
   0x7   :  { %p106_p4 = pnand %p105_p3, %p99_p0 }
   0x9   :  { %109 = shalt.err (!%p106_p4)
}
   0xa   :  { %20 = dma.hbm_to_vmem [thread:$0]  %s138_s1, 256, %s18_s10, [#allocation5]  }
   0xb   :  { %110 = dma.done.wait [#allocation5], 256  }
   0xc   :  { %111 = vsyncadd [#allocation5], 4294967040  ;;  %v38_v0 = vstv %s137_s0  ;;  %v29_v1 = vld [vmem:[#allocation4] sm:$0xff]  ;;  %v30_v2 = vld [vmem:[#allocation4 + $0x8] sm:$0xff]  ;;  %vm66_vm0 = vcmask 7168  }
   0xd   :  { %76 = vrcp.f32 %v38_v0  ;;  %v31_v3 = vmax.f32 %v29_v1, 1e-06  ;;  %v32_v4 = vmax.f32 %v30_v2, 1e-06 }
   0xf   :  { %78 = vlog2.f32 %v31_v3 }
  0x10   :  { %80 = vlog2.f32 %v32_v4 }
  0x1a   :  { %v77_v5 = vpop.eup %76 }
  0x1b   :  { %73 = vpush %v77_v5 }
  0x1c   :  { %v79_v6 = vpop.eup %78 }
  0x1d   :  { %v81_v7 = vpop.eup %80  ;;  %v35_v8 = vmul.f32 0.6931472, %v79_v6 }
  0x1e   :  { %v37_v9 = vmul.f32 0.6931472, %v81_v7 }
  0x1f   :  { %v39_v10 = vmul.f32 %v38_v0, %v35_v8 }
  0x20   :  { %v40_v11 = vmul.f32 %v38_v0, %v37_v9 }
  0x21   :  { %v41_v12 = vmul.f32 1.442695, %v39_v10 }
  0x22   :  { %v43_v13 = vmul.f32 1.442695, %v40_v11 }
  0x23   :  { %82 = vpow2.f32 %v41_v12 }
  0x24   :  { %84 = vpow2.f32 %v43_v13 }
  0x30   :  { %v83_v14 = vpop.eup %82 }
  0x31   :  { %v85_v15 = vpop.eup %84 }
  0x32   :  { %v46_v16 = vadd.f32 %v85_v15, %v83_v14 }
  0x34   :  { %53 = vadd.xlane.f32.xlu0 %v46_v16 }
  0x4c   :  { %s74_s0 = spop %73 }
  0x4d   :  { %v62_v20 = vstv %s74_s0 }
  0xbd   :  { %v54_v17 = vpop.xlane.xlu0 %53 }
  0xbe   :  { %v55_v18 = vmul.f32 0.00390625, %v54_v17 }
  0xc0   :  { %86 = vlog2.f32 %v55_v18 }
  0xcd   :  { %v87_v19 = vpop.eup %86 }
  0xce   :  { %v61_v21 = vmul.f32 0.6931472, %v87_v19 }
  0xd0   :  { %v63_v22 = vmul.f32 %v62_v20, %v61_v21 }
  0xd2   :  { %v64_v23 = vmul.f32 1.442695, %v63_v22 }
  0xd4   :  { %88 = vpow2.f32 %v64_v23 }
  0xe1   :  { %v89_v24 = vpop.eup %88 }
  0xe2   :  { %67 = vst.msk [vmem:[%s139_s2] sm:$0xff] %vm66_vm0, %v89_v24 }
  0xe3   :  { %72 = vsyncpa [#allocation5], 1 }

</bundles_post_ra>
